<compile_context>
chip_gen: v6e
topology: v6e:2x2x1
jax: 0.10.0
libtpu: 0.0.40
codegen_flags: <defaults>
</compile_context>

<pallas_src>
import functools

import jax
import jax.numpy as jnp
from jax.experimental import pallas as pl
from jax.experimental.pallas import tpu as pltpu

N_LANDMARKS = 68
N_OUT = N_LANDMARKS * 2          # 136 output lanes (no padding in HBM)


def _kp_landmark_kernel(x_ref, w_ref, part_ref, acc_ref):
    """One (parallel partition p, K-step k) grid point of the landmark regressor."""
    ki = pl.program_id(1)

    @pl.when(ki == 0)
    def _():
        acc_ref[...] = jnp.zeros_like(acc_ref)

    # ---- image preprocessing: x = clamp((x + 1) / 2, 0, 1) * 255 ----
    xk = x_ref[...]                                       # (1, tk) f32 chunk
    xk = jnp.clip((xk + 1.0) * 0.5, 0.0, 1.0) * 255.0

    # TODO(synk): the pretrained RetinaFace detector + FaRL/ibug300w aligner
    # ('facer' library) have no Pallas equivalent; a deterministic linear
    # landmark regressor (streamed bf16 matmul, f32 accumulation) stands in
    # for faces['alignment'][0] here.
    acc_ref[...] += jnp.dot(
        xk.astype(jnp.bfloat16), w_ref[...],
        preferred_element_type=jnp.float32)               # (1, N_OUT) f32

    # Emit this partition's partial landmark vector once, on its last K step.
    @pl.when(ki == pl.num_programs(1) - 1)
    def _():
        part_ref[...] = acc_ref[...]


def _grid_geometry(feat, tk, n_par_req=2):
    """Static tiling decisions: K tile, #parallel partitions, padded K length."""
    tk = min(int(tk), pl.cdiv(feat, 128) * 128)
    tk = max(128, (tk // 128) * 128)                      # lane-aligned K tile
    steps = pl.cdiv(feat, tk)
    n_par = n_par_req if steps >= n_par_req else 1        # megacore split (v7x)
    steps_per_core = pl.cdiv(steps, n_par)
    feat_pad = n_par * steps_per_core * tk
    return tk, n_par, steps_per_core, feat_pad


def _vmem_limit_bytes(tk):
    """Actual double-buffered need (with 136->256 VMEM lane tiling) + headroom."""
    lane_pad = pl.cdiv(N_OUT, 128) * 128                  # 256 lanes in VMEM layout
    w_bufs = 2 * tk * lane_pad * 2                        # double-buffered bf16 W
    x_bufs = 2 * 8 * tk * 4                               # double-buffered (1, tk) f32
    misc = 8 * lane_pad * 4 * 4                           # acc / output / slack
    need = w_bufs + x_bufs + misc
    # Keep well under v7x's 64 MiB physical VMEM; v5e/v6e have 128 MiB.
    return int(min(max(need + (12 << 20), 32 << 20), 48 << 20))


def prepare_aligner(weight, key_points, *, tk=32768):
    """One-time prep: bf16-cast + K-pad the weight, flatten the key points.

    Done once outside the per-call path so the large weight is never re-read,
    re-cast or re-padded per invocation.
    """
    feat = weight.shape[0]
    tk, n_par, steps_per_core, feat_pad = _grid_geometry(feat, tk)
    w_pad = jnp.zeros((feat_pad, N_OUT), jnp.bfloat16)
    w_pad = w_pad.at[:feat, :].set(weight.astype(jnp.bfloat16))
    kp_flat = key_points.reshape(N_OUT).astype(jnp.float32)
    geom = dict(tk=tk, n_par=n_par, steps_per_core=steps_per_core,
                feat_pad=feat_pad)
    return w_pad, kp_flat, geom


@functools.partial(jax.jit,
                   static_argnames=("tk", "n_par", "steps_per_core", "feat_pad"))
def kp_loss(x, kp_flat, w_pad, *, tk, n_par, steps_per_core, feat_pad):
    """x: (B, C, H, W) in [-1, 1]; kp_flat: (136,); w_pad: (feat_pad, 136) bf16."""
    B, C, H, W = x.shape
    feat = C * H * W

    # Only batch/face index 0 contributes to the loss -> prune the batch.
    x0 = x[0:1].reshape(1, feat).astype(jnp.float32)
    x_padded = jnp.zeros((1, feat_pad), jnp.float32).at[:, :feat].set(x0)

    cost = pl.CostEstimate(
        flops=2 * feat_pad * N_OUT,
        transcendentals=0,
        bytes_accessed=w_pad.size * 2 + x_padded.size * 4 + n_par * N_OUT * 4)

    partials = pl.pallas_call(
        _kp_landmark_kernel,
        out_shape=jax.ShapeDtypeStruct((n_par, 1, N_OUT), jnp.float32),
        grid=(n_par, steps_per_core),
        in_specs=[
            # x chunk for (partition p, step k)
            pl.BlockSpec((1, tk), lambda p, k: (0, p * steps_per_core + k)),
            # W chunk (bf16, 136 lanes, full last dim -> no lane padding in HBM)
            pl.BlockSpec((tk, N_OUT), lambda p, k: (p * steps_per_core + k, 0)),
        ],
        # Per-partition partial landmark vector (first dim squeezed in-kernel).
        out_specs=pl.BlockSpec((None, 1, N_OUT), lambda p, k: (p, 0, 0)),
        scratch_shapes=[pltpu.VMEM((1, N_OUT), jnp.float32)],
        compiler_params=pltpu.CompilerParams(
            dimension_semantics=("parallel", "arbitrary"),
            vmem_limit_bytes=_vmem_limit_bytes(tk)),
        cost_estimate=cost,
    )(x_padded, w_pad)

    # Combine the (at most 2) partial landmark vectors and take the 136-lane MSE.
    ld = partials.reshape(n_par, N_OUT).sum(axis=0)        # (136,)
    d = ld - kp_flat
    return jnp.mean(d * d)


def _reference(x, key_points, weight):
    """Pure-JAX reference of the same computation (bf16 weights, f32 acc)."""
    feat = x.shape[1] * x.shape[2] * x.shape[3]
    xf = x[0:1].reshape(1, feat).astype(jnp.float32)
    xf = jnp.clip((xf + 1.0) * 0.5, 0.0, 1.0) * 255.0
    ld = jnp.dot(xf.astype(jnp.bfloat16), weight.astype(jnp.bfloat16),
                 preferred_element_type=jnp.float32).reshape(N_OUT)
    kp = key_points.reshape(N_OUT).astype(jnp.float32)
    d = ld - kp
    return jnp.mean(d * d)


if __name__ == "__main__":
    key = jax.random.PRNGKey(0)
    k_img, k_kp, k_w = jax.random.split(key, 3)

    B, C, H, W = 2, 3, 16, 16                              # small RGB images
    feat = C * H * W                                       # 768

    x = jax.random.uniform(k_img, (B, C, H, W), jnp.float32, -1.0, 1.0)
    key_points = jax.random.uniform(k_kp, (1, N_LANDMARKS, 2), jnp.float32,
                                    0.0, float(H))
    # deterministic synthetic "aligner" weights (stand-in for facer models)
    weight = jax.random.normal(k_w, (feat, N_OUT), jnp.float32) * 0.01

    # One-time weight prep (tk=256 at this small size -> 2 partitions x 2 steps).
    w_pad, kp_flat, geom = prepare_aligner(weight, key_points, tk=256)

    out = jax.block_until_ready(kp_loss(x, kp_flat, w_pad, **geom))
    ref = jax.block_until_ready(_reference(x, key_points, weight))

    assert jnp.isfinite(out), "kernel produced non-finite loss"
    assert jnp.allclose(out, ref, rtol=1e-3, atol=1e-3), (out, ref)
    print("KERNEL_OK")
</pallas_src>

<mosaic_0001>
module attributes {stable_mosaic.version = 11 : i64} {
  func.func @_kp_landmark_kernel(%arg0: i32, %arg1: i32, %arg2: memref<1x256xf32, #tpu.memory_space<vmem>>, %arg3: memref<256x136xbf16, #tpu.memory_space<vmem>>, %arg4: memref<1x1x136xf32, #tpu.memory_space<vmem>>, %arg5: memref<1x136xf32, #tpu.memory_space<vmem>>) attributes {dimension_semantics = [#tpu.dimension_semantics<parallel>, #tpu.dimension_semantics<arbitrary>], iteration_bounds = array<i64: 2, 2>, scalar_prefetch = 0 : i64, scratch_operands = 1 : i64, tpu.core_type = #tpu.core_type<tc>, window_params = [{transform_indices = @transform_0, window_bounds = array<i64: 1, 256>}, {transform_indices = @transform_1, window_bounds = array<i64: 256, 136>}, {transform_indices = @transform_2, window_bounds = array<i64: 1, 1, 136>}]} {
    %c0_i32 = arith.constant 0 : i32
    %0 = arith.cmpi eq, %arg1, %c0_i32 : i32
    %1 = arith.extui %0 : i1 to i32
    %c0_i32_0 = arith.constant 0 : i32
    %2 = arith.cmpi ne, %1, %c0_i32_0 : i32
    scf.if %2 {
      %cst_14 = arith.constant 0.000000e+00 : f32
      %23 = vector.broadcast %cst_14 : f32 to vector<1x136xf32>
      %c0_15 = arith.constant 0 : index
      %c0_16 = arith.constant 0 : index
      %24 = vector.load %arg5[%c0_15, %c0_16] : memref<1x136xf32, #tpu.memory_space<vmem>>, vector<1x136xf32>
      tpu.vector_store %arg5[%c0_15, %c0_16], %23 {strides = array<i32>} : memref<1x136xf32, #tpu.memory_space<vmem>>, vector<1x136xf32>,
    } else {
    }
    %c0 = arith.constant 0 : index
    %c0_1 = arith.constant 0 : index
    %3 = vector.load %arg2[%c0, %c0_1] : memref<1x256xf32, #tpu.memory_space<vmem>>, vector<1x256xf32>
    %cst = arith.constant 1.000000e+00 : f32
    %4 = vector.broadcast %cst : f32 to vector<1x256xf32>
    %5 = arith.addf %3, %4 : vector<1x256xf32>
    %cst_2 = arith.constant 5.000000e-01 : f32
    %6 = vector.broadcast %cst_2 : f32 to vector<1x256xf32>
    %7 = arith.mulf %5, %6 : vector<1x256xf32>
    %cst_3 = arith.constant 0.000000e+00 : f32
    %cst_4 = arith.constant 1.000000e+00 : f32
    %8 = vector.broadcast %cst_3 : f32 to vector<1x256xf32>
    %9 = arith.maximumf %8, %7 : vector<1x256xf32>
    %10 = vector.broadcast %cst_4 : f32 to vector<1x256xf32>
    %11 = arith.minimumf %10, %9 : vector<1x256xf32>
    %cst_5 = arith.constant 2.550000e+02 : f32
    %12 = vector.broadcast %cst_5 : f32 to vector<1x256xf32>
    %13 = arith.mulf %11, %12 : vector<1x256xf32>
    %c0_6 = arith.constant 0 : index
    %c0_7 = arith.constant 0 : index
    %14 = vector.load %arg5[%c0_6, %c0_7] : memref<1x136xf32, #tpu.memory_space<vmem>>, vector<1x136xf32>
    %15 = arith.truncf %13 : vector<1x256xf32> to vector<1x256xbf16>
    %c0_8 = arith.constant 0 : index
    %c0_9 = arith.constant 0 : index
    %16 = vector.load %arg3[%c0_8, %c0_9] : memref<256x136xbf16, #tpu.memory_space<vmem>>, vector<256x136xbf16>
    %cst_10 = arith.constant dense<0.000000e+00> : vector<1x136xf32>
    %17 = tpu.matmul %15, %16, %cst_10 {dimension_numbers = #tpu.dot_dimension_numbers<[1], [0], [0], [1], [0, 0, 1, 1], [], []>} : vector<1x256xbf16>, vector<256x136xbf16>, vector<1x136xf32> -> vector<1x136xf32>
    %18 = arith.addf %14, %17 : vector<1x136xf32>
    %c0_11 = arith.constant 0 : index
    %c0_12 = arith.constant 0 : index
    %19 = vector.load %arg5[%c0_11, %c0_12] : memref<1x136xf32, #tpu.memory_space<vmem>>, vector<1x136xf32>
    tpu.vector_store %arg5[%c0_11, %c0_12], %18 {strides = array<i32>} : memref<1x136xf32, #tpu.memory_space<vmem>>, vector<1x136xf32>,
    %c1_i32 = arith.constant 1 : i32
    %20 = arith.cmpi eq, %arg1, %c1_i32 : i32
    %21 = arith.extui %20 : i1 to i32
    %c0_i32_13 = arith.constant 0 : i32
    %22 = arith.cmpi ne, %21, %c0_i32_13 : i32
    scf.if %22 {
      %c0_14 = arith.constant 0 : index
      %c0_15 = arith.constant 0 : index
      %23 = vector.load %arg5[%c0_14, %c0_15] : memref<1x136xf32, #tpu.memory_space<vmem>>, vector<1x136xf32>
      %c0_16 = arith.constant 0 : index
      %c0_17 = arith.constant 0 : index
      %c0_18 = arith.constant 0 : index
      %24 = vector.load %arg4[%c0_16, %c0_17, %c0_18] : memref<1x1x136xf32, #tpu.memory_space<vmem>>, vector<1x1x136xf32>
      %25 = vector.shape_cast %24 : vector<1x1x136xf32> to vector<1x136xf32>
      %26 = vector.shape_cast %23 : vector<1x136xf32> to vector<1x1x136xf32>
      tpu.vector_store %arg4[%c0_16, %c0_17, %c0_18], %26 {strides = array<i32>} : memref<1x1x136xf32, #tpu.memory_space<vmem>>, vector<1x1x136xf32>,
    } else {
    }
    return
  }
  func.func @transform_0(%arg0: i32, %arg1: i32) -> (i32, i32) {
    %c2_i32 = arith.constant 2 : i32
    %0 = arith.muli %arg0, %c2_i32 : i32
    %1 = arith.addi %0, %arg1 : i32
    %c0_i32 = arith.constant 0 : i32
    %c0_i32_0 = arith.constant 0 : i32
    return %c0_i32, %1 : i32, i32
  }
  func.func @transform_1(%arg0: i32, %arg1: i32) -> (i32, i32) {
    %c2_i32 = arith.constant 2 : i32
    %0 = arith.muli %arg0, %c2_i32 : i32
    %1 = arith.addi %0, %arg1 : i32
    %c0_i32 = arith.constant 0 : i32
    %c0_i32_0 = arith.constant 0 : i32
    return %1, %c0_i32 : i32, i32
  }
  func.func @transform_2(%arg0: i32, %arg1: i32) -> (i32, i32, i32) {
    %c0_i32 = arith.constant 0 : i32
    %c0_i32_0 = arith.constant 0 : i32
    %c0_i32_1 = arith.constant 0 : i32
    return %arg0, %c0_i32, %c0_i32_0 : i32, i32, i32
  }
}

</mosaic_0001>

<bundles_post_ra>
// kernel: kp_loss.1
= control target key start
LH: loop header
LB: loop body
LE: loop exit
PB: predicated region body
PF: predicated region fallthrough
CT: control target
= control target key end

     0   :  { %s771_s9 = smov 0   ;;  %s773_s10 = smov 0   ;;  %s877_s0 = inlined_call_operand.vmem [shape: f32[1,1024], index: 0, kind: input, shape index: {}]   ;;  %s878_s1 = inlined_call_operand.vmem [shape: bf16[1024,136], index: 1, kind: input, shape index: {}]   ;;  %s879_s2 = inlined_call_operand.vmem [shape: f32[2,1,136], index: 2, kind: output, shape index: {}]  }
   0x1   :  { %s775_s11 = smov 0   ;;  %s777_s12 = smov 0  }
   0x2   :  { %s779_s13 = smov 0  }
   0x3 LB: > { %s21_s14 = sadd.s32 1, %s744_s11  ;;  %s24_s15 = sadd.s32 1, %s748_s12  ;;  %s752_s13 = sphi %s779_s13, %s12_s13   ;;  %s748_s12 = sphi %s777_s12, %s883_s12   ;;  %s744_s11 = sphi %s775_s11, %s882_s11   ;;  %s740_s10 = sphi %s773_s10, %s881_s10   ;;  %s736_s9 = sphi %s771_s9, %s880_s9  }
   0x4   : > { %p22_p0 = scmp.ge.s32.totalorder %s21_s14, 2  ;;  %p579_p1 = scmp.ge.s32.totalorder %s752_s13, 1 }
   0x5   : > { %p152_p2 = scmp.lt.s32.totalorder %s752_s13, 5 }
   0x6   : > { %s885_s14 = smov (%p22_p0, %s21_s14), 0  ;;  %s887_s15 = smov (!%p22_p0, %s24_s15), %s748_s12 }
   0x7   : > { %p153_p3 = pnand %p579_p1, %p152_p2  ;;  %p26_p4 = scmp.ge.s32.totalorder %s887_s15, 2 }
   0x8   : > { %s580_s16 = sshll.u32 (!%p153_p3), %s740_s10, 1  ;;  %p202_p5 = scmp.lt.s32.totalorder (!%p153_p3), %s740_s10, 1 }
   0x9   : > { %s889_s15 = smov (%p26_p4, %s887_s15), 0  ;;  %156 = sbr.rel (%p153_p3) target bundleno = 304 (0x130), region = 28 }
   0xa   : > { %s183_s17 = sadd.s32 (!%p153_p3), %s736_s9, %s580_s16  ;;  %p587_p8 = scmp.ne.s32.totalorder (!%p153_p3), %s736_s9, 0 }
   0xb   : > { %s581_s18 = sshll.u32 (!%p153_p3), %s183_s17, 1  ;;  %s583_s19 = sshll.u32 (!%p153_p3), %s183_s17, 5 }
   0xc   : > { %p185_p6 = scmp.lt.s32.totalorder (!%p153_p3), %s581_s18, 7  ;;  %p194_p7 = scmp.lt.s32.totalorder (!%p153_p3), %s583_s19, 127 }
   0xe   : > { %s891_s10 = smov (!%p202_p5, %s740_s10), 1  ;;  %s893_s18 = smov (!%p185_p6, %s581_s18), 7 }
   0xf   : > { %s895_s19 = smov (!%p194_p7, %s583_s19), 127  ;;  %s187_s22 = scalar_lea.vmem %s877_s0, %s893_s18 }
  0x10   : > { %s586_s23 = sshll.u32 %s891_s10, 1  ;;  %s623_s24 = sshll.u32 %s895_s19, 3 }
  0x11   : > { %s813_s27 = scalar_lea.vmem %s879_s2, %s586_s23  ;;  %s818_s30 = scalar_lea.vmem %s878_s1, %s623_s24 }
  0x12   : > { %209 = sbr.rel (%p587_p8) target bundleno = 27 (0x1b), region = 32 }
  0x17   : > { %v210_v0 = vlaneseq  ;;  %v754_v1 = vmov 0.0  }
  0x19   : > { %vm212_vm0 = vcmp.lt.s32.totalorder %v210_v0, 136 }
  0x1a   : > { %214 = vst.msk [vmem:[#allocation2] sm:$0x3] %vm212_vm0, %v754_v1 }
  0x1b PF: > { %v666_v2 = vld [vmem:[%s818_s30 + $0x74] ss:$8 sps:$4 sm:$0xff]   ;;  %v668_v3 = vld [vmem:[%s818_s30 + $0x70] ss:$8 sps:$4 sm:$0xff]   ;;  %v669_v4 = vld [vmem:[%s818_s30 + $0x64] ss:$8 sps:$4 sm:$0xff]   ;;  %v223_v15 = vlaneseq }
  0x1c   : > { %427 = vmatprep.subr.bf16.mxu0 %v666_v2  ;;  %v671_v5 = vld [vmem:[%s818_s30 + $0x60] ss:$8 sps:$4 sm:$0xff]   ;;  %v672_v6 = vld [vmem:[%s818_s30 + $0x54] ss:$8 sps:$4 sm:$0xff]   ;;  %v674_v7 = vld [vmem:[%s818_s30 + $0x50] ss:$8 sps:$4 sm:$0xff]  }
  0x1d   : > { %428 = vmatpush1.bf16.msra.mxu0 %v668_v3  ;;  %v675_v8 = vld [vmem:[%s818_s30 + $0x44] ss:$8 sps:$4 sm:$0xff]   ;;  %v677_v9 = vld [vmem:[%s818_s30 + $0x40] ss:$8 sps:$4 sm:$0xff]   ;;  %v678_v10 = vld [vmem:[%s818_s30 + $0x34] ss:$8 sps:$4 sm:$0xff]  }
  0x1e   : > { %429 = vmatprep.subr.bf16.mxu0 %v669_v4  ;;  %v680_v11 = vld [vmem:[%s818_s30 + $0x30] ss:$8 sps:$4 sm:$0xff]   ;;  %v681_v12 = vld [vmem:[%s818_s30 + $0x24] ss:$8 sps:$4 sm:$0xff]   ;;  %v683_v13 = vld [vmem:[%s818_s30 + $0x20] ss:$8 sps:$4 sm:$0xff]  }
  0x1f   : > { %v684_v14 = vld [vmem:[%s818_s30 + $0x14] ss:$8 sps:$4 sm:$0xff]   ;;  %v215_v16 = vld [vmem:[%s187_s22] sm:$0x3]  ;;  %v686_v18 = vld [vmem:[%s818_s30 + $0x10] ss:$8 sps:$4 sm:$0xff]  }
  0x20   : > { %v216_v17 = vadd.f32 1.0, %v215_v16  ;;  %v687_v19 = vld [vmem:[%s818_s30 + $0x4] ss:$8 sps:$4 sm:$0xff]   ;;  %v224_v21 = vshrl.u32 %v223_v15, 7  ;;  %v689_v23 = vld [vmem:[%s818_s30] ss:$8 sps:$4 sm:$0xff]  }
  0x21   : > { %430 = vmatpush1.bf16.msra.mxu0 %v671_v5  ;;  %v690_v24 = vld [vmem:[%s818_s30 + $0xf4] ss:$8 sps:$4 sm:$0xff]   ;;  %v692_v28 = vld [vmem:[%s818_s30 + $0xf0] ss:$8 sps:$4 sm:$0xff]   ;;  %v693_v29 = vld [vmem:[%s818_s30 + $0xe4] ss:$8 sps:$4 sm:$0xff]  }
  0x22   : > { %431 = vmatprep.subr.bf16.mxu0 %v672_v6  ;;  %v217_v20 = vmul.f32 0.5, %v216_v17  ;;  %v229_v26 = vsub.s32 1, %v224_v21  ;;  %v695_v32 = vld [vmem:[%s818_s30 + $0xe0] ss:$8 sps:$4 sm:$0xff]   ;;  %v696_v33 = vld [vmem:[%s818_s30 + $0xd4] ss:$8 sps:$4 sm:$0xff]  }
  0x23   : > { %v698_v34 = vld [vmem:[%s818_s30 + $0xd0] ss:$8 sps:$4 sm:$0xff]   ;;  %v699_v35 = vld [vmem:[%s818_s30 + $0xc4] ss:$8 sps:$4 sm:$0xff]   ;;  %v701_v36 = vld [vmem:[%s818_s30 + $0xc0] ss:$8 sps:$4 sm:$0xff]  }
  0x24   : > { %v218_v22 = vmax.f32 %v217_v20, 0.0  ;;  %v702_v37 = vld [vmem:[%s818_s30 + $0xb4] ss:$8 sps:$4 sm:$0xff]   ;;  %v704_v38 = vld [vmem:[%s818_s30 + $0xb0] ss:$8 sps:$4 sm:$0xff]   ;;  %v225_v42 = vsub.s32 0, %v224_v21 }
  0x25   : > { %432 = vmatpush1.bf16.msra.mxu0 %v674_v7  ;;  %v705_v39 = vld [vmem:[%s818_s30 + $0xa4] ss:$8 sps:$4 sm:$0xff]   ;;  %v707_v40 = vld [vmem:[%s818_s30 + $0xa0] ss:$8 sps:$4 sm:$0xff]   ;;  %v708_v41 = vld [vmem:[%s818_s30 + $0x94] ss:$8 sps:$4 sm:$0xff]  }
  0x26   : > { %433 = vmatprep.subr.bf16.mxu0 %v675_v8  ;;  %v219_v25 = vmin.f32 %v218_v22, 1.0  ;;  %v710_v43 = vld [vmem:[%s818_s30 + $0x90] ss:$8 sps:$4 sm:$0xff]   ;;  %v711_v44 = vld [vmem:[%s818_s30 + $0x84] ss:$8 sps:$4 sm:$0xff]   ;;  %vm489_vm1 = vcmp.lt.s32.totalorder %v223_v15, 136 }
  0x27   : > { %v713_v46 = vld [vmem:[%s818_s30 + $0x80] ss:$8 sps:$4 sm:$0xff]   ;;  %v755_v48 = vmov 1966171168   ;;  %p620_p9 = scmp.ne.s32.totalorder %s736_s9, 1 }
  0x28   : > { %v220_v27 = vmul.f32 255.0, %v219_v25  ;;  %v472_v49 = vunpack.c.l.s4 %v755_v48  ;;  %v221_v57 = vld [vmem:[#allocation2] sm:$0x3] }
  0x29   : > { %434 = vmatpush1.bf16.msra.mxu0 %v677_v9 }
  0x2a   : > { %435 = vmatprep.subr.bf16.mxu0 %v678_v10  ;;  %v230_v30 = vrot.slane %v220_v27, %v229_v26  ;;  %v226_v45 = vrot.slane %v220_v27, %v225_v42  ;;  %v473_v50 = vunpack.c.0.s8 %v472_v49 }
  0x2c   : > { %v234_v31 = vpack.c.bf16 %v230_v30, %v230_v30  ;;  %v233_v47 = vpack.c.bf16 %v226_v45, %v226_v45  ;;  %v476_v52 = vsub.s32 %v473_v50, %v224_v21 }
  0x2d   : > { %436 = vmatpush1.bf16.msra.mxu0 %v680_v11 }
  0x2e   : > { %437 = vmatprep.subr.bf16.mxu0 %v681_v12  ;;  %459 = vmatprep.mubr.bf16.mxu0 %v234_v31 }
  0x31   : > { %438 = vmatpush1.bf16.msra.mxu0 %v683_v13 }
  0x32   : > { %439 = vmatprep.subr.bf16.mxu0 %v684_v14 }
  0x35   : > { %440 = vmatpush1.bf16.msra.mxu0 %v686_v18 }
  0x36   : > { %441 = vmatprep.subr.bf16.mxu0 %v687_v19 }
  0x39   : > { %442 = vmatpush1.bf16.msra.mxu0 %v689_v23 }
  0x3a   : > { %443 = vmatprep.subr.bf16.mxu0 %v690_v24 }
  0x3d   : > { %444 = vmatpush2.bf16.msra.mxu0 %v692_v28 }
  0x3e   : > { %445 = vmatprep.subr.bf16.mxu0 %v693_v29 }
  0x41   : > { %446 = vmatpush2.bf16.msra.mxu0 %v695_v32 }
  0x42   : > { %447 = vmatprep.subr.bf16.mxu0 %v696_v33 }
  0x45   : > { %448 = vmatpush2.bf16.msra.mxu0 %v698_v34 }
  0x46   : > { %449 = vmatprep.subr.bf16.mxu0 %v699_v35 }
  0x49   : > { %450 = vmatpush2.bf16.msra.mxu0 %v701_v36 }
  0x4a   : > { %451 = vmatprep.subr.bf16.mxu0 %v702_v37 }
  0x4d   : > { %452 = vmatpush2.bf16.msra.mxu0 %v704_v38 }
  0x4e   : > { %453 = vmatprep.subr.bf16.mxu0 %v705_v39 }
  0x51   : > { %454 = vmatpush2.bf16.msra.mxu0 %v707_v40 }
  0x52   : > { %455 = vmatprep.subr.bf16.mxu0 %v708_v41 }
  0x55   : > { %456 = vmatpush2.bf16.msra.mxu0 %v710_v43 }
  0x56   : > { %457 = vmatprep.subr.bf16.mxu0 %v711_v44 }
  0x59   : > { %458 = vmatpush2.bf16.msra.mxu0 %v713_v46 }
  0x5c   : > { %460 = vmatmul.mubr.bf16.vlgmr.msra.gmra.mxu0 %v233_v47 }
 0x11c   : > { %v461_v51 = vpop.f32.mrf.mxu0 }
 0x11e   : > { %v463_v53 = vpop.f32.mrf.mxu0 }
 0x11f   : > { %v470_v54 = vcombine.low %v461_v51, %v463_v53 }
 0x120   : > { %v465_v55 = vpop.f32.mrf.mxu0 }
 0x121   : > { %v477_v56 = vrot.slane %v470_v54, %v476_v52 }
 0x122   : > { %v466_v58 = vpop.f32.mrf.mxu0 }
 0x123   : > { %v484_v59 = vrot.slane %v477_v56, %v476_v52  ;;  %495 = sbr.rel (%p620_p9) target bundleno = 304 (0x130), region = 36 }
 0x125   : > { %v486_v60 = vadd.f32 %v484_v59, %v221_v57 }
 0x127   : > { %491 = vst.msk [vmem:[#allocation2] sm:$0x3] %vm489_vm1, %v486_v60 }
 0x12e   : > { %v496_v61 = vld [vmem:[#allocation2] sm:$0x3] }
 0x12f   : > { %497 = vst.msk [vmem:[%s813_s27] sm:$0x3] %vm489_vm1, %v496_v61 }
 0x130 PF: > { %s12_s13 = sadd.s32 1, %s752_s13   ;;  %s880_s9 = smov %s744_s11 }
 0x131   : > { %p9_p10 = scmp.ge.s32.totalorder %s12_s13, 6   ;;  %s881_s10 = smov %s748_s12 }
 0x132   : > { %s882_s11 = smov %s885_s14  ;;  %s883_s12 = smov %s889_s15 }
 0x133   :  { %11 = sbr.rel (!%p9_p10) target bundleno = 3 (0x3), region = 69 }

</bundles_post_ra>
